<compile_context>
chip_gen: v6e
topology: v6e:2x2x1
jax: 0.10.0
libtpu: 0.0.40
codegen_flags: <defaults>
</compile_context>

<pallas_src>
from math import sqrt

import numpy as np
import jax
import jax.numpy as jnp
from jax.experimental import pallas as pl
from jax.experimental.pallas import tpu as pltpu


# ----------------------------------------------------------------------------
# Pallas kernel A: head-fused BlockDiagonalLinear projections + gate nonlins.
# Batched over M = T*B rows (state independent => fully parallel).
# ----------------------------------------------------------------------------
def fused_blockdiag_proj_kernel(xcs_ref, xl_ref, wq_ref, wk_ref, wv_ref, wo_ref,
                                wi_ref, wf_ref,
                                q_ref, k_ref, v_ref, og_ref, ig_ref, fg_ref):
    xcs = xcs_ref[...]                                         # (M, U)
    xl = xl_ref[...]                                           # (M, U)
    # Block-diagonal q/k/v (heads fused along the output dim -> H*U = 128 lanes).
    q_ref[...] = jnp.dot(xcs, wq_ref[...], preferred_element_type=jnp.float32)
    k_ref[...] = jnp.dot(xcs, wk_ref[...], preferred_element_type=jnp.float32)
    v_ref[...] = jnp.dot(xl, wv_ref[...], preferred_element_type=jnp.float32)
    # Output gate (dense per head, fused) + sigmoid.
    og_ref[...] = jax.nn.sigmoid(
        jnp.dot(xl, wo_ref[...], preferred_element_type=jnp.float32))
    # Input / forget gate scalars per head via one matmul each (replaces 2H
    # cross-lane reductions per step in the old kernel).
    ig_ref[...] = jnp.exp(
        jnp.dot(xl, wi_ref[...], preferred_element_type=jnp.float32))
    fg_ref[...] = jax.nn.sigmoid(
        jnp.dot(xl, wf_ref[...], preferred_element_type=jnp.float32))


def fused_blockdiag_proj(x_cs, x_left, Wq, Wk, Wv, Wo, Wi, Wf):
    M, U = x_cs.shape
    HU = Wq.shape[1]
    H = Wi.shape[1]

    def full(shape):
        return pl.BlockSpec(shape, lambda i, n=len(shape): (0,) * n)

    out_shape = (
        jax.ShapeDtypeStruct((M, HU), jnp.float32),   # q
        jax.ShapeDtypeStruct((M, HU), jnp.float32),   # k
        jax.ShapeDtypeStruct((M, HU), jnp.float32),   # v
        jax.ShapeDtypeStruct((M, HU), jnp.float32),   # sigmoid(o_tilde)
        jax.ShapeDtypeStruct((M, H), jnp.float32),    # exp(i_tilde)
        jax.ShapeDtypeStruct((M, H), jnp.float32),    # sigmoid(f_tilde)
    )
    return pl.pallas_call(
        fused_blockdiag_proj_kernel,
        out_shape=out_shape,
        grid_spec=pltpu.PrefetchScalarGridSpec(
            num_scalar_prefetch=0,
            grid=(1,),
            in_specs=[full((M, U)), full((M, U)),
                      full((U, HU)), full((U, HU)), full((U, HU)), full((U, HU)),
                      full((U, H)), full((U, H))],
            out_specs=(full((M, HU)), full((M, HU)), full((M, HU)), full((M, HU)),
                       full((M, H)), full((M, H))),
        ),
        compiler_params=pltpu.CompilerParams(dimension_semantics=("parallel",)),
    )(x_cs, x_left, Wq, Wk, Wv, Wo, Wi, Wf)


# ----------------------------------------------------------------------------
# Pallas kernel B: the irreducible sequential recurrence.
# grid=(1,), lax.fori_loop over T; (C, n) resident in VMEM the whole time.
# Rows are head-major (H*B, U): state update and readout are head-vectorized.
# ----------------------------------------------------------------------------
def mlstm_recurrence_kernel(q_ref, k_ref, v_ref, og_ref, ig_ref, fg_ref,
                            c0_ref, n0_ref,
                            h_ref, c_ref, n_ref):
    # One-time state load (replaces the old per-grid-step @pl.when(t == 0) guard).
    c_ref[...] = c0_ref[...]
    n_ref[...] = n0_ref[...]
    T = q_ref.shape[0]

    def step(t, carry):
        q = q_ref[t]                                           # (HB, U)
        k = k_ref[t]
        v = v_ref[t]
        og = og_ref[t]
        ig = ig_ref[t]                                         # (HB, 1)
        fg = fg_ref[t]                                         # (HB, 1)

        outer = v[:, :, None] * k[:, None, :]                  # (HB, U, U)
        C = fg[:, :, None] * c_ref[...] + ig[:, :, None] * outer
        n = fg * n_ref[...] + ig * k
        c_ref[...] = C
        n_ref[...] = n

        num = jnp.sum(C * q[:, None, :], axis=-1)              # C @ q  -> (HB, U)
        dot_nq = jnp.sum(n * q, axis=-1, keepdims=True)        # (HB, 1)
        denom = jnp.maximum(jnp.abs(dot_nq), 1.0)
        h_ref[t] = og * (num / denom)                          # VMEM store; HBM write
        return carry                                           # happens once at the end

    jax.lax.fori_loop(0, T, step, 0, unroll=True)


def mlstm_recurrence(q_seq, k_seq, v_seq, og_seq, ig_seq, fg_seq, C0, n0):
    T, HB, U = q_seq.shape

    def full(shape):
        return pl.BlockSpec(shape, lambda i, n=len(shape): (0,) * n)

    out_shape = (
        jax.ShapeDtypeStruct((T, HB, U), jnp.float32),   # h_tilde per step
        jax.ShapeDtypeStruct((HB, U, U), jnp.float32),   # final C
        jax.ShapeDtypeStruct((HB, U), jnp.float32),      # final n
    )
    # TODO(synk): for large B/H on v7x, add a leading "parallel" grid axis over the
    # H*B rows so the second TensorCore runs an independent slice of the recurrence.
    return pl.pallas_call(
        mlstm_recurrence_kernel,
        out_shape=out_shape,
        grid_spec=pltpu.PrefetchScalarGridSpec(
            num_scalar_prefetch=0,
            grid=(1,),
            in_specs=[full((T, HB, U)), full((T, HB, U)), full((T, HB, U)),
                      full((T, HB, U)), full((T, HB, 1)), full((T, HB, 1)),
                      full((HB, U, U)), full((HB, U))],
            out_specs=(full((T, HB, U)), full((HB, U, U)), full((HB, U))),
        ),
        compiler_params=pltpu.CompilerParams(dimension_semantics=("arbitrary",)),
    )(q_seq, k_seq, v_seq, og_seq, ig_seq, fg_seq, C0, n0)


# ----------------------------------------------------------------------------
# One mLSTMCell applied over a (T, B, F) sequence:
#   XLA pre-pass (batched over T*B) -> Pallas fused projections -> Pallas
#   recurrence -> XLA post-pass (GroupNorm, skip/right, down-proj, residual).
# ----------------------------------------------------------------------------
def run_cell_phase(x_seq, C, n, p, H):
    T, B, F = x_seq.shape
    D = p['Winp'].shape[1]
    U = p['Wl'].shape[1]
    M = T * B

    # ---- hoisted, state-independent pre-pass (fills >=8 sublanes via T*B batching) --
    xr = x_seq.reshape(M, F)
    x = xr @ p['Winp']                                          # (M, D)
    mu = jnp.mean(x, axis=-1, keepdims=True)
    var = jnp.mean((x - mu) ** 2, axis=-1, keepdims=True)
    x_ln = (x - mu) * jax.lax.rsqrt(var + 1e-5) * p['ln_g'] + p['ln_b']
    x_left = x_ln @ p['Wl']                                     # (M, U)
    x_right = x_ln @ p['Wr']                                    # (M, U)
    x_conv = x_left @ p['ConvM'] + p['conv_b']                  # causal conv as banded matmul
    x_cs = x_conv * jax.nn.sigmoid(x_conv)                      # Swish
    skip = x_left @ p['Wskip'] + p['bskip']                     # (M, U)
    right = x_right * jax.nn.sigmoid(x_right)                   # (M, U)

    # ---- Pallas: fused BlockDiagonalLinear projections + gate nonlinearities --------
    q, k, v, og, ig, fg = fused_blockdiag_proj(
        x_cs, x_left, p['Wq'], p['Wk'], p['Wv'], p['Wo'], p['Wi'], p['Wf'])

    # Reorganize to the head-major (T, H*B, U) layout the recurrence uses.
    def to_hb(a):                                               # (M, H*U) -> (T, H*B, U)
        return a.reshape(T, B, H, U).transpose(0, 2, 1, 3).reshape(T, H * B, U)

    def gate_hb(a):                                             # (M, H) -> (T, H*B, 1)
        return a.reshape(T, B, H).transpose(0, 2, 1).reshape(T, H * B, 1)

    q_seq, k_seq, v_seq, og_seq = to_hb(q), to_hb(k), to_hb(v), to_hb(og)
    ig_seq, fg_seq = gate_hb(ig), gate_hb(fg)

    # ---- Pallas: sequential state update / readout ----------------------------------
    h_til, C, n = mlstm_recurrence(q_seq, k_seq, v_seq, og_seq, ig_seq, fg_seq, C, n)

    # ---- hoisted post-pass: GroupNorm(2, U) over head-stacked tensor, skip/right,
    #      heads concatenated, down-projection + residual (one (T*B, H*U)@(H*U, D)) ---
    U2 = U // 2
    hh = h_til.reshape(T, H, B, U).transpose(0, 2, 3, 1)        # (T, B, U, H)
    g = hh.reshape(T, B, 2, U2 * H)                             # two groups of U/2 chans x H heads
    gm = jnp.mean(g, axis=-1, keepdims=True)
    gv = jnp.mean((g - gm) ** 2, axis=-1, keepdims=True)
    gn = ((g - gm) * jax.lax.rsqrt(gv + 1e-5)).reshape(T, B, U, H)
    gn = gn * p['gn_g'][None, None, :, None] + p['gn_b'][None, None, :, None]
    total = gn + skip.reshape(T, B, U)[..., None] + right.reshape(T, B, U)[..., None]
    total = total.transpose(0, 1, 3, 2).reshape(T, B, H * U)    # heads along last dim
    h_seq = x.reshape(T, B, D) + total @ p['Wdown']             # (T, B, D)
    return h_seq, C, n


# ----------------------------------------------------------------------------
# Parameter construction (deterministic).
# ----------------------------------------------------------------------------
def _normal(key, shape, scale):
    return (jax.random.normal(key, shape) * scale).astype(jnp.float32)


def block_diagonal_matrix(key, dim, block_size=4, scale=1.0):
    """BlockDiagonalLinear(dim, block_size, scale): per-block bias-free Linear weights
    materialized as one dense (dim, dim) block-diagonal matrix (y = x @ M) so the whole
    layer runs as a single MXU matmul.  Handles a smaller trailing block like the spec."""
    n_full = dim // block_size
    rem = dim % block_size
    keys = jax.random.split(key, n_full + (1 if rem else 0))
    M = jnp.zeros((dim, dim), jnp.float32)
    for b in range(n_full):
        w = jax.random.normal(keys[b], (block_size, block_size)) * (1.0 / sqrt(block_size))
        M = M.at[b * block_size:(b + 1) * block_size,
                 b * block_size:(b + 1) * block_size].set(w)
    if rem > 0:
        w = jax.random.normal(keys[-1], (rem, rem)) * (1.0 / sqrt(rem))
        M = M.at[n_full * block_size:, n_full * block_size:].set(w)
    return (scale * M).astype(jnp.float32)


def fused_block_diag_heads(key, U, H, scale=1.0):
    """H BlockDiagonalLinear layers fused along the output dim -> (U, H*U)."""
    mats = [block_diagonal_matrix(k, U, 4, scale) for k in jax.random.split(key, H)]
    return jnp.concatenate(mats, axis=1)


def conv4_matrix(w, U):
    """CustomConv1D (kernel=4, pad=(2,1), NCW) folded into a banded (U, U) matrix."""
    M = jnp.zeros((U, U), jnp.float32)
    for kidx in range(4):
        M = M + w[kidx] * jnp.eye(U, k=2 - kidx, dtype=jnp.float32)
    return M


def init_cell_params(key, F_in, D, H):
    U = 2 * D
    ks = jax.random.split(key, 18)
    conv_w = jax.random.normal(ks[5], (4,)) * 0.5
    return dict(
        Winp=_normal(ks[0], (F_in, D), 1.0 / sqrt(F_in)),
        ln_g=(jnp.ones((D,), jnp.float32) + _normal(ks[1], (D,), 0.1)),
        ln_b=_normal(ks[2], (D,), 0.1),
        Wl=_normal(ks[3], (D, U), 1.0 / sqrt(D)),
        Wr=_normal(ks[4], (D, U), 1.0 / sqrt(D)),
        ConvM=conv4_matrix(conv_w, U),
        conv_b=_normal(ks[6], (), 0.5),
        Wskip=_normal(ks[7], (U, U), 1.0 / sqrt(U)),
        bskip=_normal(ks[8], (U,), 0.1),
        Wq=fused_block_diag_heads(ks[9], U, H, scale=1.0),            # (U, H*U)
        Wk=fused_block_diag_heads(ks[10], U, H, scale=1.0 / sqrt(U)),  # (U, H*U)
        Wv=fused_block_diag_heads(ks[11], U, H, scale=1.0),            # (U, H*U)
        Wi=_normal(ks[12], (U, H), 1.0 / sqrt(U)),
        Wf=_normal(ks[13], (U, H), 1.0 / sqrt(U)),
        Wo=jnp.concatenate([_normal(k, (U, U), 1.0 / sqrt(U))
                            for k in jax.random.split(ks[14], H)], axis=1),
        gn_g=(jnp.ones((U,), jnp.float32) + _normal(ks[15], (U,), 0.1)),
        gn_b=_normal(ks[16], (U,), 0.1),
        Wdown=_normal(ks[17], (H * U, D), 1.0 / sqrt(H * U)),
    )


def parse_inputs(inp, lookback, lookahead, y_size, x_size, u_size, s_size):
    sizes = [y_size, x_size, u_size, s_size, y_size, u_size]
    offs = np.cumsum([0] + sizes)
    y_past, x_past, u_past, s_past, y_future, u_future = (
        inp[..., int(offs[i]):int(offs[i + 1])] for i in range(6))
    if lookback > lookahead:
        y_future = y_future[:, :lookahead, :]
        u_future = u_future[:, :lookahead, :]
    if lookahead > lookback:
        y_past = y_past[:, :lookback, :]
        x_past = x_past[:, :lookback, :]
        u_past = u_past[:, :lookback, :]
        s_past = s_past[:, :lookback, :]
    return y_past, x_past, u_past, s_past, u_future, y_future


def mlstm_forward(x, params, *, lookback, lookahead, sizes, model_dim, num_heads, init_key):
    y_size, x_size, u_size, s_size = sizes
    y_past, x_past, u_past, s_past, u_future, _ = parse_inputs(
        x, lookback, lookahead, y_size, x_size, u_size, s_size)
    inp = jnp.concatenate([y_past, x_past, u_past, s_past], axis=-1)   # (B, lookback, F_past)
    B = inp.shape[0]
    U = 2 * model_dim
    H = num_heads

    # Reference initializes (C, n) with randn; head-major (H*B, ...) layout here.
    kc, kn = jax.random.split(init_key)
    C = jax.random.normal(kc, (H * B, U, U), jnp.float32)
    n = jax.random.normal(kn, (H * B, U), jnp.float32)

    # past phase: only the state carries forward
    x_past_seq = jnp.transpose(inp, (1, 0, 2))                         # (lookback, B, F_past)
    _, C, n = run_cell_phase(x_past_seq, C, n, params['past'], H)

    # future phase: produce h per step
    x_fut_seq = jnp.transpose(u_future, (1, 0, 2))                     # (lookahead, B, u_size)
    h_seq, C, n = run_cell_phase(x_fut_seq, C, n, params['future'], H)

    out = jnp.einsum('tbd,dy->tby', h_seq, params['Wout']) + params['bout']
    return jnp.transpose(out, (1, 0, 2))                               # (B, lookahead, y_size)


if __name__ == "__main__":
    x_size, y_size, u_size, s_size = 3, 2, 2, 1
    lookback, lookahead = 4, 3
    model_dim, num_heads = 32, 2
    B = 2
    T = max(lookback, lookahead)
    feat = y_size + x_size + u_size + s_size + y_size + u_size         # = 12

    key = jax.random.PRNGKey(0)
    kx, kp, kf, ko, kb, kstate = jax.random.split(key, 6)

    x = jax.random.normal(kx, (B, T, feat), jnp.float32)

    F_past = x_size + y_size + u_size + s_size
    params = dict(
        past=init_cell_params(kp, F_past, model_dim, num_heads),
        future=init_cell_params(kf, u_size, model_dim, num_heads),
        Wout=_normal(ko, (model_dim, y_size), 1.0 / sqrt(model_dim)),
        bout=_normal(kb, (y_size,), 0.1),
    )

    out = mlstm_forward(
        x, params,
        lookback=lookback, lookahead=lookahead,
        sizes=(y_size, x_size, u_size, s_size),
        model_dim=model_dim, num_heads=num_heads,
        init_key=kstate,
    )
    out = jax.block_until_ready(out)

    assert out.shape == (B, lookahead, y_size), out.shape
    assert bool(jnp.all(jnp.isfinite(out)))
    print("KERNEL_OK")
</pallas_src>

<mosaic_0001>
module attributes {stable_mosaic.version = 11 : i64} {
  func.func @fused_blockdiag_proj_kernel(%arg0: i32, %arg1: memref<8x64xf32, #tpu.memory_space<vmem>>, %arg2: memref<8x64xf32, #tpu.memory_space<vmem>>, %arg3: memref<64x128xf32, #tpu.memory_space<vmem>>, %arg4: memref<64x128xf32, #tpu.memory_space<vmem>>, %arg5: memref<64x128xf32, #tpu.memory_space<vmem>>, %arg6: memref<64x128xf32, #tpu.memory_space<vmem>>, %arg7: memref<64x2xf32, #tpu.memory_space<vmem>>, %arg8: memref<64x2xf32, #tpu.memory_space<vmem>>, %arg9: memref<8x128xf32, #tpu.memory_space<vmem>>, %arg10: memref<8x128xf32, #tpu.memory_space<vmem>>, %arg11: memref<8x128xf32, #tpu.memory_space<vmem>>, %arg12: memref<8x128xf32, #tpu.memory_space<vmem>>, %arg13: memref<8x2xf32, #tpu.memory_space<vmem>>, %arg14: memref<8x2xf32, #tpu.memory_space<vmem>>) attributes {dimension_semantics = [#tpu.dimension_semantics<parallel>], iteration_bounds = array<i64: 1>, scalar_prefetch = 0 : i64, scratch_operands = 0 : i64, tpu.core_type = #tpu.core_type<tc>, window_params = [{pipeline_mode = #tpu.pipeline_mode<synchronous>, transform_indices = @transform_0, window_bounds = array<i64: 8, 64>}, {pipeline_mode = #tpu.pipeline_mode<synchronous>, transform_indices = @transform_1, window_bounds = array<i64: 8, 64>}, {pipeline_mode = #tpu.pipeline_mode<synchronous>, transform_indices = @transform_2, window_bounds = array<i64: 64, 128>}, {pipeline_mode = #tpu.pipeline_mode<synchronous>, transform_indices = @transform_3, window_bounds = array<i64: 64, 128>}, {pipeline_mode = #tpu.pipeline_mode<synchronous>, transform_indices = @transform_4, window_bounds = array<i64: 64, 128>}, {pipeline_mode = #tpu.pipeline_mode<synchronous>, transform_indices = @transform_5, window_bounds = array<i64: 64, 128>}, {pipeline_mode = #tpu.pipeline_mode<synchronous>, transform_indices = @transform_6, window_bounds = array<i64: 64, 2>}, {pipeline_mode = #tpu.pipeline_mode<synchronous>, transform_indices = @transform_7, window_bounds = array<i64: 64, 2>}, {pipeline_mode = #tpu.pipeline_mode<synchronous>, transform_indices = @transform_8, window_bounds = array<i64: 8, 128>}, {pipeline_mode = #tpu.pipeline_mode<synchronous>, transform_indices = @transform_9, window_bounds = array<i64: 8, 128>}, {pipeline_mode = #tpu.pipeline_mode<synchronous>, transform_indices = @transform_10, window_bounds = array<i64: 8, 128>}, {pipeline_mode = #tpu.pipeline_mode<synchronous>, transform_indices = @transform_11, window_bounds = array<i64: 8, 128>}, {pipeline_mode = #tpu.pipeline_mode<synchronous>, transform_indices = @transform_12, window_bounds = array<i64: 8, 2>}, {pipeline_mode = #tpu.pipeline_mode<synchronous>, transform_indices = @transform_13, window_bounds = array<i64: 8, 2>}]} {
    %c0 = arith.constant 0 : index
    %c0_0 = arith.constant 0 : index
    %0 = vector.load %arg1[%c0, %c0_0] : memref<8x64xf32, #tpu.memory_space<vmem>>, vector<8x64xf32>
    %c0_1 = arith.constant 0 : index
    %c0_2 = arith.constant 0 : index
    %1 = vector.load %arg2[%c0_1, %c0_2] : memref<8x64xf32, #tpu.memory_space<vmem>>, vector<8x64xf32>
    %c0_3 = arith.constant 0 : index
    %c0_4 = arith.constant 0 : index
    %2 = vector.load %arg3[%c0_3, %c0_4] : memref<64x128xf32, #tpu.memory_space<vmem>>, vector<64x128xf32>
    %cst = arith.constant dense<0.000000e+00> : vector<8x128xf32>
    %3 = tpu.matmul %0, %2, %cst {dimension_numbers = #tpu.dot_dimension_numbers<[1], [0], [0], [1], [0, 0, 1, 1], [], []>} : vector<8x64xf32>, vector<64x128xf32>, vector<8x128xf32> -> vector<8x128xf32>
    %c0_5 = arith.constant 0 : index
    %c0_6 = arith.constant 0 : index
    %4 = vector.load %arg9[%c0_5, %c0_6] : memref<8x128xf32, #tpu.memory_space<vmem>>, vector<8x128xf32>
    tpu.vector_store %arg9[%c0_5, %c0_6], %3 {strides = array<i32>} : memref<8x128xf32, #tpu.memory_space<vmem>>, vector<8x128xf32>,
    %c0_7 = arith.constant 0 : index
    %c0_8 = arith.constant 0 : index
    %5 = vector.load %arg4[%c0_7, %c0_8] : memref<64x128xf32, #tpu.memory_space<vmem>>, vector<64x128xf32>
    %cst_9 = arith.constant dense<0.000000e+00> : vector<8x128xf32>
    %6 = tpu.matmul %0, %5, %cst_9 {dimension_numbers = #tpu.dot_dimension_numbers<[1], [0], [0], [1], [0, 0, 1, 1], [], []>} : vector<8x64xf32>, vector<64x128xf32>, vector<8x128xf32> -> vector<8x128xf32>
    %c0_10 = arith.constant 0 : index
    %c0_11 = arith.constant 0 : index
    %7 = vector.load %arg10[%c0_10, %c0_11] : memref<8x128xf32, #tpu.memory_space<vmem>>, vector<8x128xf32>
    tpu.vector_store %arg10[%c0_10, %c0_11], %6 {strides = array<i32>} : memref<8x128xf32, #tpu.memory_space<vmem>>, vector<8x128xf32>,
    %c0_12 = arith.constant 0 : index
    %c0_13 = arith.constant 0 : index
    %8 = vector.load %arg5[%c0_12, %c0_13] : memref<64x128xf32, #tpu.memory_space<vmem>>, vector<64x128xf32>
    %cst_14 = arith.constant dense<0.000000e+00> : vector<8x128xf32>
    %9 = tpu.matmul %1, %8, %cst_14 {dimension_numbers = #tpu.dot_dimension_numbers<[1], [0], [0], [1], [0, 0, 1, 1], [], []>} : vector<8x64xf32>, vector<64x128xf32>, vector<8x128xf32> -> vector<8x128xf32>
    %c0_15 = arith.constant 0 : index
    %c0_16 = arith.constant 0 : index
    %10 = vector.load %arg11[%c0_15, %c0_16] : memref<8x128xf32, #tpu.memory_space<vmem>>, vector<8x128xf32>
    tpu.vector_store %arg11[%c0_15, %c0_16], %9 {strides = array<i32>} : memref<8x128xf32, #tpu.memory_space<vmem>>, vector<8x128xf32>,
    %c0_17 = arith.constant 0 : index
    %c0_18 = arith.constant 0 : index
    %11 = vector.load %arg6[%c0_17, %c0_18] : memref<64x128xf32, #tpu.memory_space<vmem>>, vector<64x128xf32>
    %cst_19 = arith.constant dense<0.000000e+00> : vector<8x128xf32>
    %12 = tpu.matmul %1, %11, %cst_19 {dimension_numbers = #tpu.dot_dimension_numbers<[1], [0], [0], [1], [0, 0, 1, 1], [], []>} : vector<8x64xf32>, vector<64x128xf32>, vector<8x128xf32> -> vector<8x128xf32>
    %13 = arith.negf %12 : vector<8x128xf32>
    %14 = math.exp %13 : vector<8x128xf32>
    %cst_20 = arith.constant 1.000000e+00 : f32
    %15 = vector.broadcast %cst_20 : f32 to vector<8x128xf32>
    %16 = arith.addf %15, %14 : vector<8x128xf32>
    %17 = arith.divf %15, %16 : vector<8x128xf32>
    %c0_21 = arith.constant 0 : index
    %c0_22 = arith.constant 0 : index
    %18 = vector.load %arg12[%c0_21, %c0_22] : memref<8x128xf32, #tpu.memory_space<vmem>>, vector<8x128xf32>
    tpu.vector_store %arg12[%c0_21, %c0_22], %17 {strides = array<i32>} : memref<8x128xf32, #tpu.memory_space<vmem>>, vector<8x128xf32>,
    %c0_23 = arith.constant 0 : index
    %c0_24 = arith.constant 0 : index
    %19 = vector.load %arg7[%c0_23, %c0_24] : memref<64x2xf32, #tpu.memory_space<vmem>>, vector<64x2xf32>
    %cst_25 = arith.constant dense<0.000000e+00> : vector<8x2xf32>
    %20 = tpu.matmul %1, %19, %cst_25 {dimension_numbers = #tpu.dot_dimension_numbers<[1], [0], [0], [1], [0, 0, 1, 1], [], []>} : vector<8x64xf32>, vector<64x2xf32>, vector<8x2xf32> -> vector<8x2xf32>
    %21 = math.exp %20 : vector<8x2xf32>
    %c0_26 = arith.constant 0 : index
    %c0_27 = arith.constant 0 : index
    %22 = vector.load %arg13[%c0_26, %c0_27] : memref<8x2xf32, #tpu.memory_space<vmem>>, vector<8x2xf32>
    tpu.vector_store %arg13[%c0_26, %c0_27], %21 {strides = array<i32>} : memref<8x2xf32, #tpu.memory_space<vmem>>, vector<8x2xf32>,
    %c0_28 = arith.constant 0 : index
    %c0_29 = arith.constant 0 : index
    %23 = vector.load %arg8[%c0_28, %c0_29] : memref<64x2xf32, #tpu.memory_space<vmem>>, vector<64x2xf32>
    %cst_30 = arith.constant dense<0.000000e+00> : vector<8x2xf32>
    %24 = tpu.matmul %1, %23, %cst_30 {dimension_numbers = #tpu.dot_dimension_numbers<[1], [0], [0], [1], [0, 0, 1, 1], [], []>} : vector<8x64xf32>, vector<64x2xf32>, vector<8x2xf32> -> vector<8x2xf32>
    %25 = arith.negf %24 : vector<8x2xf32>
    %26 = math.exp %25 : vector<8x2xf32>
    %cst_31 = arith.constant 1.000000e+00 : f32
    %27 = vector.broadcast %cst_31 : f32 to vector<8x2xf32>
    %28 = arith.addf %27, %26 : vector<8x2xf32>
    %29 = arith.divf %27, %28 : vector<8x2xf32>
    %c0_32 = arith.constant 0 : index
    %c0_33 = arith.constant 0 : index
    %30 = vector.load %arg14[%c0_32, %c0_33] : memref<8x2xf32, #tpu.memory_space<vmem>>, vector<8x2xf32>
    tpu.vector_store %arg14[%c0_32, %c0_33], %29 {strides = array<i32>} : memref<8x2xf32, #tpu.memory_space<vmem>>, vector<8x2xf32>,
    return
  }
  func.func @transform_0(%arg0: i32) -> (i32, i32) {
    %c0_i32 = arith.constant 0 : i32
    %c0_i32_0 = arith.constant 0 : i32
    %c0_i32_1 = arith.constant 0 : i32
    return %c0_i32, %c0_i32_0 : i32, i32
  }
  func.func @transform_1(%arg0: i32) -> (i32, i32) {
    %c0_i32 = arith.constant 0 : i32
    %c0_i32_0 = arith.constant 0 : i32
    %c0_i32_1 = arith.constant 0 : i32
    return %c0_i32, %c0_i32_0 : i32, i32
  }
  func.func @transform_2(%arg0: i32) -> (i32, i32) {
    %c0_i32 = arith.constant 0 : i32
    %c0_i32_0 = arith.constant 0 : i32
    %c0_i32_1 = arith.constant 0 : i32
    return %c0_i32, %c0_i32_0 : i32, i32
  }
  func.func @transform_3(%arg0: i32) -> (i32, i32) {
    %c0_i32 = arith.constant 0 : i32
    %c0_i32_0 = arith.constant 0 : i32
    %c0_i32_1 = arith.constant 0 : i32
    return %c0_i32, %c0_i32_0 : i32, i32
  }
  func.func @transform_4(%arg0: i32) -> (i32, i32) {
    %c0_i32 = arith.constant 0 : i32
    %c0_i32_0 = arith.constant 0 : i32
    %c0_i32_1 = arith.constant 0 : i32
    return %c0_i32, %c0_i32_0 : i32, i32
  }
  func.func @transform_5(%arg0: i32) -> (i32, i32) {
    %c0_i32 = arith.constant 0 : i32
    %c0_i32_0 = arith.constant 0 : i32
    %c0_i32_1 = arith.constant 0 : i32
    return %c0_i32, %c0_i32_0 : i32, i32
  }
  func.func @transform_6(%arg0: i32) -> (i32, i32) {
    %c0_i32 = arith.constant 0 : i32
    %c0_i32_0 = arith.constant 0 : i32
    %c0_i32_1 = arith.constant 0 : i32
    return %c0_i32, %c0_i32_0 : i32, i32
  }
  func.func @transform_7(%arg0: i32) -> (i32, i32) {
    %c0_i32 = arith.constant 0 : i32
    %c0_i32_0 = arith.constant 0 : i32
    %c0_i32_1 = arith.constant 0 : i32
    return %c0_i32, %c0_i32_0 : i32, i32
  }
  func.func @transform_8(%arg0: i32) -> (i32, i32) {
    %c0_i32 = arith.constant 0 : i32
    %c0_i32_0 = arith.constant 0 : i32
    %c0_i32_1 = arith.constant 0 : i32
    return %c0_i32, %c0_i32_0 : i32, i32
  }
  func.func @transform_9(%arg0: i32) -> (i32, i32) {
    %c0_i32 = arith.constant 0 : i32
    %c0_i32_0 = arith.constant 0 : i32
    %c0_i32_1 = arith.constant 0 : i32
    return %c0_i32, %c0_i32_0 : i32, i32
  }
  func.func @transform_10(%arg0: i32) -> (i32, i32) {
    %c0_i32 = arith.constant 0 : i32
    %c0_i32_0 = arith.constant 0 : i32
    %c0_i32_1 = arith.constant 0 : i32
    return %c0_i32, %c0_i32_0 : i32, i32
  }
  func.func @transform_11(%arg0: i32) -> (i32, i32) {
    %c0_i32 = arith.constant 0 : i32
    %c0_i32_0 = arith.constant 0 : i32
    %c0_i32_1 = arith.constant 0 : i32
    return %c0_i32, %c0_i32_0 : i32, i32
  }
  func.func @transform_12(%arg0: i32) -> (i32, i32) {
    %c0_i32 = arith.constant 0 : i32
    %c0_i32_0 = arith.constant 0 : i32
    %c0_i32_1 = arith.constant 0 : i32
    return %c0_i32, %c0_i32_0 : i32, i32
  }
  func.func @transform_13(%arg0: i32) -> (i32, i32) {
    %c0_i32 = arith.constant 0 : i32
    %c0_i32_0 = arith.constant 0 : i32
    %c0_i32_1 = arith.constant 0 : i32
    return %c0_i32, %c0_i32_0 : i32, i32
  }
}

</mosaic_0001>

<bundles_post_ra>
// kernel: tpu_custom_call.1
= control target key start
LH: loop header
LB: loop body
LE: loop exit
PB: predicated region body
PF: predicated region fallthrough
CT: control target
= control target key end

     0   :  { %19 = vsyncpa [#allocation3], 0  ;;  %s1303_s0 = inlined_call_operand.hbm [shape: f32[8,64], index: 0, kind: input, shape index: {}]   ;;  %s1304_s1 = inlined_call_operand.hbm [shape: f32[8,64], index: 1, kind: input, shape index: {}]   ;;  %s1305_s2 = inlined_call_operand.vmem [shape: f32[64,128], index: 2, kind: input, shape index: {}]   ;;  %s1306_s3 = inlined_call_operand.vmem [shape: f32[64,128], index: 3, kind: input, shape index: {}]   ;;  %s1307_s4 = inlined_call_operand.hbm [shape: f32[64,128], index: 4, kind: input, shape index: {}]   ;;  %s1308_s5 = inlined_call_operand.hbm [shape: f32[64,128], index: 5, kind: input, shape index: {}]   ;;  %s1309_s6 = inlined_call_operand.vmem [shape: f32[64,2], index: 6, kind: input, shape index: {}]   ;;  %s1310_s7 = inlined_call_operand.vmem [shape: f32[64,2], index: 7, kind: input, shape index: {}]   ;;  %s1311_s8 = inlined_call_operand.hbm [shape: f32[8,128], index: 8, kind: output, shape index: {0}]   ;;  %s1312_s9 = inlined_call_operand.hbm [shape: f32[8,128], index: 9, kind: output, shape index: {1}]   ;;  %s1313_s10 = inlined_call_operand.hbm [shape: f32[8,128], index: 10, kind: output, shape index: {2}]   ;;  %s1314_s11 = inlined_call_operand.hbm [shape: f32[8,128], index: 11, kind: output, shape index: {3}]   ;;  %s1315_s12 = inlined_call_operand.vmem [shape: f32[8,2], index: 12, kind: output, shape index: {4}]   ;;  %s1316_s13 = inlined_call_operand.vmem [shape: f32[8,2], index: 13, kind: output, shape index: {5}]  }
   0x1   :  { %20 = vsyncpa [#allocation6], 0 }
   0x2   :  { %21 = vsyncpa [#allocation9], 0 }
   0x3   :  { %22 = vsyncpa [#allocation4], 0 }
   0x4   :  { %23 = vsyncpa [#allocation12], 0 }
   0x5   :  { %24 = vsyncpa [#allocation15], 0  ;;  %s1023_s25 = smov [#allocation5]   ;;  %s1024_s27 = smov [#allocation2]  }
   0x6   :  { %s41_s26 = sshll.u32 %s1023_s25, 4  ;;  %s31_s28 = sshll.u32 %s1024_s27, 4  ;;  %s42_s26 = int_to_ptr.vmem [resolvable:$true] %s41_s26  ;;  %s32_s28 = int_to_ptr.vmem [resolvable:$true] %s31_s28 }
   0x7   :  { %s859_s29 = scalar_lea.vmem %s42_s26, 128  ;;  %p864_p1 = scmp.lt.s32.totalorder %s42_s26, %s42_s26 }
   0x8   :  { %p860_p0 = scmp.ne.s32.totalorder %s42_s26, %s859_s29  ;;  %p865_p2 = scmp.lt.s32.totalorder %s859_s29, %s859_s29 }
   0xa   :  { %p866_p3 = por %p865_p2, %p864_p1 }
   0xc   :  { %p867_p4 = pnand %p866_p3, %p860_p0 }
   0xe   :  { %870 = shalt.err (!%p867_p4)
}
   0xf   :  { %44 = dma.hbm_to_vmem [thread:$0]  %s1304_s1, 128, %s42_s26, [#allocation6]  }
  0x10   :  { %s879_s15 = scalar_lea.vmem %s32_s28, 128  ;;  %p884_p6 = scmp.lt.s32.totalorder %s32_s28, %s32_s28 }
  0x11   :  { %p880_p5 = scmp.ne.s32.totalorder %s32_s28, %s879_s15  ;;  %p885_p7 = scmp.lt.s32.totalorder %s879_s15, %s879_s15 }
  0x13   :  { %p886_p8 = por %p885_p7, %p884_p6 }
  0x15   :  { %p887_p9 = pnand %p886_p8, %p880_p5 }
  0x17   :  { %890 = shalt.err (!%p887_p9)
}
  0x18   :  { %34 = dma.hbm_to_vmem [thread:$0]  %s1303_s0, 128, %s32_s28, [#allocation3]  }
  0x19   :  { %s1025_s18 = smov [#allocation7]  }
  0x1a   :  { %s54_s19 = sshll.u32 %s1025_s18, 4  ;;  %s55_s19 = int_to_ptr.vmem [resolvable:$true] %s54_s19 }
  0x1b   :  { %s899_s20 = scalar_lea.vmem %s55_s19, 1024  ;;  %p904_p11 = scmp.lt.s32.totalorder %s55_s19, %s55_s19 }
  0x1c   :  { %p900_p10 = scmp.ne.s32.totalorder %s55_s19, %s899_s20  ;;  %p905_p12 = scmp.lt.s32.totalorder %s899_s20, %s899_s20 }
  0x1e   :  { %p906_p13 = por %p905_p12, %p904_p11 }
  0x20   :  { %p907_p0 = pnand %p906_p13, %p900_p10 }
  0x22   :  { %910 = shalt.err (!%p907_p0)
}
  0x23   :  { %s1026_s1 = smov 128   ;;  %s1027_s21 = smov 8  }
  0x24   :  { %60 = dma.hbm_to_vmem [thread:$0]  %s1307_s4, 1024, %s55_s19, [#allocation6], %s1026_s1, %s1026_s1, %s1027_s21  }
  0x25   :  { %s1028_s24 = smov [#allocation8]  }
  0x26   :  { %s66_s25 = sshll.u32 %s1028_s24, 4  ;;  %s67_s25 = int_to_ptr.vmem [resolvable:$true] %s66_s25 }
  0x27   :  { %s919_s0 = scalar_lea.vmem %s67_s25, 1024  ;;  %p924_p2 = scmp.lt.s32.totalorder %s67_s25, %s67_s25 }
  0x28   :  { %p920_p1 = scmp.ne.s32.totalorder %s67_s25, %s919_s0  ;;  %p925_p3 = scmp.lt.s32.totalorder %s919_s0, %s919_s0 }
  0x2a   :  { %p926_p4 = por %p925_p3, %p924_p2 }
  0x2c   :  { %p927_p5 = pnand %p926_p4, %p920_p1 }
  0x2e   :  { %930 = shalt.err (!%p927_p5)
}
  0x2f   :  { %72 = dma.hbm_to_vmem [thread:$0]  %s1308_s5, 1024, %s67_s25, [#allocation9], %s1026_s1, %s1026_s1, %s1027_s21  }
  0x30   :  { %1011 = dma.done.wait [#allocation3], 128  }
  0x31   :  { %1012 = vsyncadd [#allocation3], 4294967168 }
  0x32   :  { %1013 = dma.done.wait [#allocation6], 1152  }
  0x33   :  { %1014 = vsyncadd [#allocation6], 4294966144 }
  0x34   :  { %1015 = dma.done.wait [#allocation9], 1024  }
  0x35   :  { %1016 = vsyncadd [#allocation9], 4294966272  ;;  %v1029_v0 = vmov 0.0   ;;  %vm1030_vm0 = vmmov 0   ;;  %v181_v1 = vld [vmem:[%s1306_s3 + $0x38] sm:$0xff]  ;;  %v180_v2 = vld [vmem:[%s1306_s3 + $0x30] sm:$0xff] }
  0x36   :  { %734 = vmatprep.subr.mxu1 %v1029_v0  ;;  %715 = vmatprep.subr.mxu0 %v1029_v0  ;;  %v179_v3 = vld [vmem:[%s1306_s3 + $0x28] sm:$0xff]  ;;  %v98_v4 = vld [vmem:[%s1305_s2 + $0x38] sm:$0xff]  ;;  %v97_v5 = vld [vmem:[%s1305_s2 + $0x30] sm:$0xff]  ;;  %vm99_vm1 = vcmask 523264   ;;  %s1031_s25 = smov [#allocation11]   ;;  %s1032_s26 = smov [#allocation10]  }
  0x37   :  { %750 = vmatprep.mubr.msk.f32.mxu1 %vm1030_vm0, %v1029_v0  ;;  %731 = vmatprep.mubr.msk.f32.mxu0 %vm1030_vm0, %v1029_v0  ;;  %v178_v6 = vld [vmem:[%s1306_s3 + $0x20] sm:$0xff]  ;;  %v96_v7 = vld [vmem:[%s1305_s2 + $0x28] sm:$0xff]  ;;  %v177_v8 = vld [vmem:[%s1306_s3 + $0x18] sm:$0xff]  ;;  %s603_s0 = sshll.u32 %s1031_s25, 4  ;;  %s593_s27 = sshll.u32 %s1032_s26, 4  ;;  %s604_s0 = int_to_ptr.vmem [resolvable:$true] %s603_s0  ;;  %s594_s27 = int_to_ptr.vmem [resolvable:$true] %s593_s27 }
  0x38   :  { %735 = vmatpush3.msra.mxu1 %v181_v1  ;;  %716 = vmatpush3.msra.mxu0 %v98_v4  ;;  %v95_v9 = vld [vmem:[%s1305_s2 + $0x20] sm:$0xff]  ;;  %v176_v10 = vld [vmem:[%s1306_s3 + $0x10] sm:$0xff]  ;;  %v94_v11 = vld [vmem:[%s1305_s2 + $0x18] sm:$0xff]  ;;  %s931_s4 = scalar_lea.vmem %s604_s0, 128  ;;  %p936_p7 = scmp.lt.s32.totalorder %s604_s0, %s604_s0 }
  0x39   :  { %736 = vmatprep.subr.mxu1 %v1029_v0  ;;  %717 = vmatprep.subr.mxu0 %v1029_v0  ;;  %v175_v12 = vld [vmem:[%s1306_s3 + $0x8] sm:$0xff]  ;;  %v93_v13 = vld [vmem:[%s1305_s2 + $0x10] sm:$0xff]  ;;  %v174_v14 = vld [vmem:[%s1306_s3] sm:$0xff]  ;;  %p932_p6 = scmp.ne.s32.totalorder %s604_s0, %s931_s4  ;;  %p937_p8 = scmp.lt.s32.totalorder %s931_s4, %s931_s4 }
  0x3a   :  { %737 = vmatpush3.msra.mxu1 %v180_v2  ;;  %718 = vmatpush3.msra.mxu0 %v97_v5  ;;  %v92_v15 = vld [vmem:[%s1305_s2 + $0x8] sm:$0xff]  ;;  %v89_v16 = vld [vmem:[#allocation2] sm:$0xff]  ;;  %v340_v20 = vld [vmem:[#allocation8 + $0x28] sm:$0xff] }
  0x3b   :  { %738 = vmatprep.subr.mxu1 %v1029_v0  ;;  %719 = vmatprep.subr.mxu0 %v1029_v0  ;;  %v342_v17 = vld [vmem:[#allocation8 + $0x38] sm:$0xff]  ;;  %v91_v18 = vld [vmem:[%s1305_s2] sm:$0xff]  ;;  %v339_v22 = vld [vmem:[#allocation8 + $0x20] sm:$0xff]  ;;  %p938_p9 = por %p937_p8, %p936_p7 }
  0x3c   :  { %739 = vmatpush3.msra.mxu1 %v179_v3  ;;  %720 = vmatpush3.msra.mxu0 %v96_v7  ;;  %v341_v19 = vld [vmem:[#allocation8 + $0x30] sm:$0xff]  ;;  %v260_v21 = vld [vmem:[#allocation7 + $0x38] sm:$0xff]  ;;  %v258_v25 = vld [vmem:[#allocation7 + $0x28] sm:$0xff] }
  0x3d   :  { %740 = vmatprep.subr.mxu1 %v1029_v0  ;;  %721 = vmatprep.subr.mxu0 %v1029_v0  ;;  %v259_v23 = vld [vmem:[#allocation7 + $0x30] sm:$0xff]  ;;  %v338_v24 = vld [vmem:[#allocation8 + $0x18] sm:$0xff]  ;;  %v257_v27 = vld [vmem:[#allocation7 + $0x20] sm:$0xff]  ;;  %p939_p10 = pnand %p938_p9, %p932_p6 }
  0x3e   :  { %741 = vmatpush3.msra.mxu1 %v178_v6  ;;  %722 = vmatpush3.msra.mxu0 %v95_v9  ;;  %v337_v26 = vld [vmem:[#allocation8 + $0x10] sm:$0xff]  ;;  %v336_v28 = vld [vmem:[#allocation8 + $0x8] sm:$0xff]  ;;  %v256_v29 = vld [vmem:[#allocation7 + $0x18] sm:$0xff] }
  0x3f   :  { %742 = vmatprep.subr.mxu1 %v1029_v0  ;;  %723 = vmatprep.subr.mxu0 %v1029_v0  ;;  %v335_v30 = vld [vmem:[#allocation8] sm:$0xff]  ;;  %v1200_v31 = vld [vmem:[#allocation5] sm:$0xff]  ;;  %v509_v32 = vld [vmem:[%s1310_s7 + $0x38] sm:$0xff] }
  0x40   :  { %743 = vmatpush3.msra.mxu1 %v177_v8  ;;  %724 = vmatpush3.msra.mxu0 %v94_v11  ;;  %v255_v33 = vld [vmem:[#allocation7 + $0x10] sm:$0xff]  ;;  %v508_v34 = vld [vmem:[%s1310_s7 + $0x30] sm:$0xff]  ;;  %v254_v35 = vld [vmem:[#allocation7 + $0x8] sm:$0xff] }
  0x41   :  { %744 = vmatprep.subr.mxu1 %v1029_v0  ;;  %725 = vmatprep.subr.mxu0 %v1029_v0  ;;  %v507_v36 = vld [vmem:[%s1310_s7 + $0x28] sm:$0xff]  ;;  %v253_v37 = vld [vmem:[#allocation7] sm:$0xff]  ;;  %v506_v38 = vld [vmem:[%s1310_s7 + $0x20] sm:$0xff] }
  0x42   :  { %745 = vmatpush3.msra.mxu1 %v176_v10  ;;  %726 = vmatpush3.msra.mxu0 %v93_v13  ;;  %v505_v39 = vld [vmem:[%s1310_s7 + $0x18] sm:$0xff]  ;;  %v504_v41 = vld [vmem:[%s1310_s7 + $0x10] sm:$0xff]  ;;  %v503_v43 = vld [vmem:[%s1310_s7 + $0x8] sm:$0xff] }
  0x43   :  { %746 = vmatprep.subr.mxu1 %v1029_v0  ;;  %727 = vmatprep.subr.mxu0 %v1029_v0  ;;  %v427_v40 = vld [vmem:[%s1309_s6 + $0x38] sm:$0xff]  ;;  %v426_v42 = vld [vmem:[%s1309_s6 + $0x30] sm:$0xff]  ;;  %v425_v44 = vld [vmem:[%s1309_s6 + $0x28] sm:$0xff] }
  0x44   :  { %747 = vmatpush3.msra.mxu1 %v175_v12  ;;  %728 = vmatpush3.msra.mxu0 %v92_v15  ;;  %v502_v45 = vld [vmem:[%s1310_s7] sm:$0xff]  ;;  %v423_v47 = vld [vmem:[%s1309_s6 + $0x18] sm:$0xff]  ;;  %v422_v48 = vld [vmem:[%s1309_s6 + $0x10] sm:$0xff] }
  0x45   :  { %748 = vmatprep.subr.mxu1 %v1029_v0  ;;  %729 = vmatprep.subr.mxu0 %v1029_v0  ;;  %v424_v46 = vld [vmem:[%s1309_s6 + $0x20] sm:$0xff]  ;;  %v421_v49 = vld [vmem:[%s1309_s6 + $0x8] sm:$0xff] }
  0x46   :  { %749 = vmatpush3.msra.mxu1 %v174_v14  ;;  %730 = vmatpush3.msra.mxu0 %v91_v18  ;;  %v420_v50 = vld [vmem:[%s1309_s6] sm:$0xff] }
  0x47   :  { %751 = vmatmul.mubr.msk.f32.vlgmr.msra.gmra.mxu1 %vm99_vm1, %v89_v16  ;;  %772 = vmatprep.subr.mxu1 %v1029_v0 }
  0x48   :  { %773 = vmatpush3.msra.mxu1 %v342_v17  ;;  %753 = vmatprep.subr.mxu0 %v1029_v0 }
  0x49   :  { %774 = vmatprep.subr.mxu1 %v1029_v0  ;;  %732 = vmatmul.mubr.msk.f32.vlgmr.msra.gmra.mxu0 %vm99_vm1, %v89_v16 }
  0x4a   :  { %775 = vmatpush3.msra.mxu1 %v341_v19  ;;  %754 = vmatpush3.msra.mxu0 %v260_v21 }
  0x4b   :  { %776 = vmatprep.subr.mxu1 %v1029_v0  ;;  %788 = vmatprep.mubr.msk.f32.mxu1 %vm1030_vm0, %v1029_v0 }
  0x4c   :  { %777 = vmatpush3.msra.mxu1 %v340_v20  ;;  %755 = vmatprep.subr.mxu0 %v1029_v0 }
  0x4d   :  { %778 = vmatprep.subr.mxu1 %v1029_v0  ;;  %756 = vmatpush3.msra.mxu0 %v259_v23 }
  0x4e   :  { %779 = vmatpush3.msra.mxu1 %v339_v22  ;;  %757 = vmatprep.subr.mxu0 %v1029_v0 }
  0x4f   :  { %780 = vmatprep.subr.mxu1 %v1029_v0  ;;  %758 = vmatpush3.msra.mxu0 %v258_v25 }
  0x50   :  { %781 = vmatpush3.msra.mxu1 %v338_v24  ;;  %759 = vmatprep.subr.mxu0 %v1029_v0 }
  0x51   :  { %782 = vmatprep.subr.mxu1 %v1029_v0  ;;  %760 = vmatpush3.msra.mxu0 %v257_v27 }
  0x52   :  { %783 = vmatpush3.msra.mxu1 %v337_v26  ;;  %761 = vmatprep.subr.mxu0 %v1029_v0 }
  0x53   :  { %784 = vmatprep.subr.mxu1 %v1029_v0  ;;  %762 = vmatpush3.msra.mxu0 %v256_v29 }
  0x54   :  { %785 = vmatpush3.msra.mxu1 %v336_v28  ;;  %763 = vmatprep.subr.mxu0 %v1029_v0 }
  0x55   :  { %786 = vmatprep.subr.mxu1 %v1029_v0  ;;  %764 = vmatpush3.msra.mxu0 %v255_v33 }
  0x56   :  { %787 = vmatpush3.msra.mxu1 %v335_v30  ;;  %765 = vmatprep.subr.mxu0 %v1029_v0 }
  0x57   :  { %789 = vmatmul.mubr.msk.f32.vlgmr.msra.gmra.mxu1 %vm99_vm1, %v1200_v31  ;;  %810 = vmatprep.subr.mxu1 %v1029_v0 }
  0x58   :  { %811 = vmatpush3.msra.mxu1 %v509_v32  ;;  %766 = vmatpush3.msra.mxu0 %v254_v35 }
  0x59   :  { %812 = vmatprep.subr.mxu1 %v1029_v0  ;;  %767 = vmatprep.subr.mxu0 %v1029_v0 }
  0x5a   :  { %813 = vmatpush3.msra.mxu1 %v508_v34  ;;  %768 = vmatpush3.msra.mxu0 %v253_v37 }
  0x5b   :  { %814 = vmatprep.subr.mxu1 %v1029_v0  ;;  %769 = vmatprep.mubr.msk.f32.mxu0 %vm1030_vm0, %v1029_v0 }
  0x5c   :  { %815 = vmatpush3.msra.mxu1 %v507_v36  ;;  %791 = vmatprep.subr.mxu0 %v1029_v0 }
  0x5d   :  { %816 = vmatprep.subr.mxu1 %v1029_v0  ;;  %770 = vmatmul.mubr.msk.f32.vlgmr.msra.gmra.mxu0 %vm99_vm1, %v1200_v31 }
  0x5e   :  { %817 = vmatpush3.msra.mxu1 %v506_v38  ;;  %792 = vmatpush3.msra.mxu0 %v427_v40 }
  0x5f   :  { %818 = vmatprep.subr.mxu1 %v1029_v0  ;;  %826 = vmatprep.mubr.msk.f32.mxu1 %vm1030_vm0, %v1029_v0 }
  0x60   :  { %819 = vmatpush3.msra.mxu1 %v505_v39  ;;  %793 = vmatprep.subr.mxu0 %v1029_v0 }
  0x61   :  { %820 = vmatprep.subr.mxu1 %v1029_v0  ;;  %794 = vmatpush3.msra.mxu0 %v426_v42 }
  0x62   :  { %821 = vmatpush3.msra.mxu1 %v504_v41  ;;  %795 = vmatprep.subr.mxu0 %v1029_v0 }
  0x63   :  { %822 = vmatprep.subr.mxu1 %v1029_v0  ;;  %796 = vmatpush3.msra.mxu0 %v425_v44 }
  0x64   :  { %823 = vmatpush3.msra.mxu1 %v503_v43  ;;  %797 = vmatprep.subr.mxu0 %v1029_v0 }
  0x65   :  { %824 = vmatprep.subr.mxu1 %v1029_v0  ;;  %798 = vmatpush3.msra.mxu0 %v424_v46 }
  0x66   :  { %825 = vmatpush3.msra.mxu1 %v502_v45  ;;  %799 = vmatprep.subr.mxu0 %v1029_v0 }
  0x67   :  { %827 = vmatmul.mubr.msk.f32.vlgmr.msra.gmra.mxu1 %vm99_vm1, %v1200_v31  ;;  %807 = vmatprep.mubr.msk.f32.mxu0 %vm1030_vm0, %v1029_v0 }
  0x68   :  { %800 = vmatpush3.msra.mxu0 %v423_v47 }
  0x69   :  { %801 = vmatprep.subr.mxu0 %v1029_v0 }
  0x6a   :  { %802 = vmatpush3.msra.mxu0 %v422_v48 }
  0x6b   :  { %803 = vmatprep.subr.mxu0 %v1029_v0 }
  0x6c   :  { %804 = vmatpush3.msra.mxu0 %v421_v49 }
  0x6d   :  { %805 = vmatprep.subr.mxu0 %v1029_v0 }
  0x6e   :  { %806 = vmatpush3.msra.mxu0 %v420_v50 }
  0x6f   :  { %808 = vmatmul.mubr.msk.f32.vlgmr.msra.gmra.mxu0 %vm99_vm1, %v1200_v31 }
 0x107   :  { %v248_v51 = vpop.f32.mrf.mxu1 }
 0x108   :  { %252 = vst [vmem:[#allocation11] sm:$0xff] %v248_v51 }
 0x109   :  { %v752_v52 = vpop.f32.mrf.mxu1 }
 0x10a   :  { %942 = shalt.err (!%p939_p10)
}
 0x10b   :  { %606 = dma.vmem_to_hbm [thread:$0]  %s604_s0, 128, %s1312_s9, [#allocation12]   ;;  %v169_v53 = vpop.f32.mrf.mxu0 }
 0x10c   :  { %173 = vst [vmem:[#allocation10] sm:$0xff] %v169_v53  ;;  %s951_s28 = scalar_lea.vmem %s594_s27, 128  ;;  %p956_p12 = scmp.lt.s32.totalorder %s594_s27, %s594_s27 }
 0x10d   :  { %v733_v54 = vpop.f32.mrf.mxu0  ;;  %p952_p11 = scmp.ne.s32.totalorder %s594_s27, %s951_s28  ;;  %p957_p13 = scmp.lt.s32.totalorder %s951_s28, %s951_s28 }
 0x10f   :  { %p958_p0 = por %p957_p13, %p956_p12 }
 0x111   :  { %p959_p1 = pnand %p958_p0, %p952_p11 }
 0x113   :  { %962 = shalt.err (!%p959_p1)
}
 0x114   :  { %596 = dma.vmem_to_hbm [thread:$0]  %s594_s27, 128, %s1311_s8, [#allocation4]  }
 0x115   :  { %s1033_s9 = smov [#allocation13]  }
 0x116   :  { %s613_s14 = sshll.u32 %s1033_s9, 4  ;;  %s614_s14 = int_to_ptr.vmem [resolvable:$true] %s613_s14 }
 0x117   :  { %v409_v55 = vpop.f32.mrf.mxu1  ;;  %s971_s15 = scalar_lea.vmem %s614_s14, 128  ;;  %p976_p3 = scmp.lt.s32.totalorder %s614_s14, %s614_s14 }
 0x118   :  { %v657_v56 = vmul.f32 -1.442695, %v409_v55  ;;  %p972_p2 = scmp.ne.s32.totalorder %s614_s14, %s971_s15  ;;  %p977_p4 = scmp.lt.s32.totalorder %s971_s15, %s971_s15 }
 0x119   :  { %v790_v57 = vpop.f32.mrf.mxu1 }
 0x11a   :  { %841 = vpow2.f32 %v657_v56  ;;  %p978_p5 = por %p977_p4, %p976_p3 }
 0x11c   :  { %p979_p6 = pnand %p978_p5, %p972_p2 }
 0x11d   :  { %v330_v58 = vpop.f32.mrf.mxu0 }
 0x11e   :  { %334 = vst [vmem:[#allocation13] sm:$0xff] %v330_v58 }
 0x11f   :  { %v771_v59 = vpop.f32.mrf.mxu0 }
 0x120   :  { %982 = shalt.err (!%p979_p6)
}
 0x121   :  { %616 = dma.vmem_to_hbm [thread:$0]  %s614_s14, 128, %s1313_s10, [#allocation12]  }
 0x122   :  { %s1034_s8 = smov [#allocation14]  }
 0x123   :  { %s623_s18 = sshll.u32 %s1034_s8, 4  ;;  %s624_s18 = int_to_ptr.vmem [resolvable:$true] %s623_s18 }
 0x124   :  { %s991_s19 = scalar_lea.vmem %s624_s18, 128  ;;  %p996_p8 = scmp.lt.s32.totalorder %s624_s18, %s624_s18 }
 0x125   :  { %p992_p7 = scmp.ne.s32.totalorder %s624_s18, %s991_s19  ;;  %p997_p9 = scmp.lt.s32.totalorder %s991_s19, %s991_s19 }
 0x127   :  { %v842_v60 = vpop.eup %841  ;;  %v576_v61 = vpop.f32.mrf.mxu1  ;;  %p998_p10 = por %p997_p9, %p996_p8 }
 0x128   :  { %v416_v62 = vadd.f32 1.0, %v842_v60  ;;  %v660_v63 = vmul.f32 -1.442695, %v576_v61 }
 0x129   :  { %v828_v0 = vpop.f32.mrf.mxu1  ;;  %p999_p11 = pnand %p998_p10, %p992_p7 }
 0x12a   :  { %843 = vrcp.f32 %v416_v62 }
 0x12b   :  { %845 = vpow2.f32 %v660_v63 }
 0x12f   :  { %v494_v1 = vpop.f32.mrf.mxu0 }
 0x130   :  { %v498_v2 = vmul.f32 1.442695, %v494_v1 }
 0x131   :  { %v809_v3 = vpop.f32.mrf.mxu0 }
 0x132   :  { %847 = vpow2.f32 %v498_v2 }
 0x137   :  { %v844_v4 = vpop.eup %843 }
 0x138   :  { %v846_v5 = vpop.eup %845  ;;  %419 = vst [vmem:[#allocation14] sm:$0xff] %v844_v4 }
 0x139   :  { %v583_v6 = vadd.f32 1.0, %v846_v5 }
 0x13a   :  { %1002 = shalt.err (!%p999_p11)
}
 0x13b   :  { %626 = dma.vmem_to_hbm [thread:$0]  %s624_s18, 128, %s1314_s11, [#allocation15]   ;;  %849 = vrcp.f32 %v583_v6  ;;  %vm500_vm2 = vcmask 15360  }
 0x13f   :  { %v848_v7 = vpop.eup %847 }
 0x140   :  { %501 = vst.msk [vmem:[%s1315_s12] sm:$0xff] %vm500_vm2, %v848_v7 }
 0x148   :  { %v850_v8 = vpop.eup %849 }
 0x149   :  { %586 = vst.msk [vmem:[%s1316_s13] sm:$0xff] %vm500_vm2, %v850_v8 }
 0x14a   :  { %1017 = dma.done.wait [#allocation4], 128  }
 0x14b   :  { %1018 = vsyncadd [#allocation4], 4294967168 }
 0x14c   :  { %1019 = dma.done.wait [#allocation12], 256  }
 0x14d   :  { %1020 = vsyncadd [#allocation12], 4294967040 }
 0x14e   :  { %1021 = dma.done.wait [#allocation15], 128  }
 0x14f   :  { %1022 = vsyncadd [#allocation15], 4294967168 }
 0x150   :  { %647 = vsyncpa [#allocation3], 1 }
 0x151   :  { %648 = vsyncpa [#allocation6], 1 }
 0x152   :  { %649 = vsyncpa [#allocation9], 1 }
 0x153   :  { %650 = vsyncpa [#allocation4], 1 }
 0x154   :  { %651 = vsyncpa [#allocation12], 1 }
 0x155   :  { %652 = vsyncpa [#allocation15], 1 }

</bundles_post_ra>
